<compile_context>
chip_gen: v5e
topology: v5e:2x2
jax: 0.10.0
libtpu: 0.0.40
codegen_flags: <defaults>
</compile_context>

<pallas_src>
import functools
import math

import jax
import jax.numpy as jnp
from jax.experimental import pallas as pl
from jax.experimental.pallas import tpu as pltpu


# ----------------------------- kernels --------------------------------------


def _unit_norm_kernel(x_ref, o_ref, *, eps):
    """UnitNorm: x / max(||x||_2 over last dim, eps).  One row-tile per step."""
    x = x_ref[...].astype(jnp.float32)                      # (TB, size)
    ss = jnp.sum(x * x, axis=-1, keepdims=True)             # (TB, 1)  cross-lane on XLU
    inv = 1.0 / jnp.maximum(jnp.sqrt(ss), eps)              # clamp(min=eps) then recip
    o_ref[...] = (x * inv).astype(o_ref.dtype)


def _layer_norm_kernel(x_ref, w_ref, b_ref, o_ref, *, eps):
    """nn.LayerNorm over the last dim.  gamma/beta stay resident in VMEM."""
    x = x_ref[...].astype(jnp.float32)                      # (TB, size)
    mean = jnp.mean(x, axis=-1, keepdims=True)
    xc = x - mean
    var = jnp.mean(xc * xc, axis=-1, keepdims=True)         # biased, as in PyTorch
    inv = jax.lax.rsqrt(var + eps)                          # EUP
    o_ref[...] = (xc * inv * w_ref[...] + b_ref[...]).astype(o_ref.dtype)


# ----------------------------- wrapper ---------------------------------------


def _round_up(a, b):
    return (a + b - 1) // b * b


def _pick_block_rows(rows, size, itemsize, block_rows):
    """Large row tile (amortize grid-step overhead) capped by a VMEM budget."""
    # Keep each buffered block around <= 2 MiB so double-buffered in+out stays
    # far below the scoped-VMEM limit even for wide feature dims.
    vmem_budget = 2 * 1024 * 1024
    max_by_vmem = max(8, vmem_budget // max(1, size * itemsize))
    tb = min(block_rows, max_by_vmem, _round_up(rows, 8))
    tb = max(8, (tb // 8) * 8)                               # multiple of 8 sublanes
    return tb


def normalize_func(x, mode="none", *, weight=None, bias=None, eps=None,
                   block_rows=512):
    """Pallas equivalent of NormalizeFunc(mode).forward(x).

    x: (..., size).  Normalization is over the last dim.
    For mode='layer', `weight`/`bias` are the LayerNorm affine params (size,);
    defaults are ones/zeros like a freshly initialized nn.LayerNorm.
    """
    if mode == "none":
        return x  # identity — no kernel needed
    if mode not in ("unit", "layer"):
        raise ValueError("Bad mode = {}".format(mode))

    orig_shape = x.shape
    size = orig_shape[-1]
    rows = math.prod(orig_shape[:-1]) if len(orig_shape) > 1 else 1
    x2 = x.reshape(rows, size)

    tb = _pick_block_rows(rows, size, jnp.dtype(x.dtype).itemsize, block_rows)
    grid = (pl.cdiv(rows, tb),)                              # partial edge block OK
    row_spec = pl.BlockSpec((tb, size), lambda i: (i, 0))
    cparams = pltpu.CompilerParams(dimension_semantics=("parallel",))

    if mode == "unit":
        e = 1e-8 if eps is None else eps
        out = pl.pallas_call(
            functools.partial(_unit_norm_kernel, eps=e),
            out_shape=jax.ShapeDtypeStruct((rows, size), x.dtype),
            grid=grid,
            in_specs=[row_spec],
            out_specs=row_spec,
            compiler_params=cparams,
        )(x2)
    else:  # mode == "layer"
        e = 1e-5 if eps is None else eps
        if weight is None:
            weight = jnp.ones((size,), jnp.float32)
        if bias is None:
            bias = jnp.zeros((size,), jnp.float32)
        w2 = weight.reshape(1, size).astype(jnp.float32)
        b2 = bias.reshape(1, size).astype(jnp.float32)
        # Constant index_map -> params DMA'd once, resident across the grid.
        param_spec = pl.BlockSpec((1, size), lambda i: (0, 0))
        out = pl.pallas_call(
            functools.partial(_layer_norm_kernel, eps=e),
            out_shape=jax.ShapeDtypeStruct((rows, size), x.dtype),
            grid=grid,
            in_specs=[row_spec, param_spec, param_spec],
            out_specs=row_spec,
            compiler_params=cparams,
        )(x2, w2, b2)

    return out.reshape(orig_shape)


# ----------------------------- pure-JAX references ---------------------------


def _unit_norm_ref(x, eps=1e-8):
    xf = x.astype(jnp.float32)
    n = jnp.sqrt(jnp.sum(xf * xf, axis=-1, keepdims=True))
    return (xf / jnp.maximum(n, eps)).astype(x.dtype)


def _layer_norm_ref(x, weight, bias, eps=1e-5):
    xf = x.astype(jnp.float32)
    m = jnp.mean(xf, axis=-1, keepdims=True)
    v = jnp.mean((xf - m) ** 2, axis=-1, keepdims=True)
    return ((xf - m) * jax.lax.rsqrt(v + eps) * weight + bias).astype(x.dtype)


# ----------------------------- demo / check -----------------------------------


if __name__ == "__main__":
    key = jax.random.PRNGKey(0)
    k_x, k_w, k_b = jax.random.split(key, 3)

    # Small shapes consistent with the module: (batch, seq, hidden) with a
    # lane-dense hidden size.
    batch, seq, size = 2, 8, 128
    x = jax.random.normal(k_x, (batch, seq, size), jnp.float32)
    gamma = jax.random.normal(k_w, (size,), jnp.float32) * 0.1 + 1.0
    beta = jax.random.normal(k_b, (size,), jnp.float32) * 0.1

    # mode='none' : identity
    out_none = jax.block_until_ready(normalize_func(x, mode="none"))
    assert out_none.shape == x.shape
    assert jnp.array_equal(out_none, x), "mode='none' must be identity"

    # mode='unit' : x / clamp(||x||_2, 1e-8)
    out_unit = jax.block_until_ready(normalize_func(x, mode="unit"))
    ref_unit = _unit_norm_ref(x)
    assert out_unit.shape == x.shape
    assert jnp.allclose(out_unit, ref_unit, atol=1e-5, rtol=1e-5), \
        "Pallas UnitNorm mismatch vs reference"

    # mode='layer' : LayerNorm(size) with affine params
    out_layer = jax.block_until_ready(
        normalize_func(x, mode="layer", weight=gamma, bias=beta))
    ref_layer = _layer_norm_ref(x, gamma, beta)
    assert out_layer.shape == x.shape
    assert jnp.allclose(out_layer, ref_layer, atol=1e-5, rtol=1e-5), \
        "Pallas LayerNorm mismatch vs reference"

    # Row count that is not a multiple of the tile (partial edge block path).
    x_odd = jax.random.normal(k_x, (3, 5, size), jnp.float32)  # 15 rows, tb=16
    out_odd = jax.block_until_ready(normalize_func(x_odd, mode="unit"))
    assert jnp.allclose(out_odd, _unit_norm_ref(x_odd), atol=1e-5, rtol=1e-5), \
        "Pallas UnitNorm mismatch on partial edge block"

    # bf16 input: math in f32, output cast back to bf16.
    x_bf = x.astype(jnp.bfloat16)
    out_bf = jax.block_until_ready(
        normalize_func(x_bf, mode="layer", weight=gamma, bias=beta))
    ref_bf = _layer_norm_ref(x_bf, gamma, beta)
    assert jnp.allclose(out_bf.astype(jnp.float32), ref_bf.astype(jnp.float32),
                        atol=2e-2, rtol=2e-2), \
        "Pallas LayerNorm mismatch on bf16 input"

    print("KERNEL_OK")
</pallas_src>

<mosaic_0001>
module attributes {stable_mosaic.version = 11 : i64} {
  func.func @_unit_norm_kernel(%arg0: i32, %arg1: memref<16x128xf32, #tpu.memory_space<vmem>>, %arg2: memref<16x128xf32, #tpu.memory_space<vmem>>) attributes {dimension_semantics = [#tpu.dimension_semantics<parallel>], iteration_bounds = array<i64: 1>, scalar_prefetch = 0 : i64, scratch_operands = 0 : i64, tpu.core_type = #tpu.core_type<tc>, window_params = [{transform_indices = @transform_0, window_bounds = array<i64: 16, 128>}, {transform_indices = @transform_1, window_bounds = array<i64: 16, 128>}]} {
    %c0 = arith.constant 0 : index
    %c0_0 = arith.constant 0 : index
    %0 = vector.load %arg1[%c0, %c0_0] : memref<16x128xf32, #tpu.memory_space<vmem>>, vector<16x128xf32>
    %1 = arith.mulf %0, %0 : vector<16x128xf32>
    %cst = arith.constant dense<0.000000e+00> : vector<16xf32>
    %2 = vector.multi_reduction <add>, %1, %cst [1] : vector<16x128xf32> to vector<16xf32>
    %3 = vector.shape_cast %2 : vector<16xf32> to vector<16x1xf32>
    %4 = math.sqrt %3 : vector<16x1xf32>
    %cst_1 = arith.constant 9.99999993E-9 : f32
    %5 = vector.broadcast %cst_1 : f32 to vector<16x1xf32>
    %6 = arith.maximumf %4, %5 : vector<16x1xf32>
    %cst_2 = arith.constant 1.000000e+00 : f32
    %7 = vector.broadcast %cst_2 : f32 to vector<16x1xf32>
    %8 = arith.divf %7, %6 : vector<16x1xf32>
    %9 = vector.broadcast %8 : vector<16x1xf32> to vector<16x128xf32>
    %10 = arith.mulf %0, %9 : vector<16x128xf32>
    %c0_3 = arith.constant 0 : index
    %c0_4 = arith.constant 0 : index
    %11 = vector.load %arg2[%c0_3, %c0_4] : memref<16x128xf32, #tpu.memory_space<vmem>>, vector<16x128xf32>
    tpu.vector_store %arg2[%c0_3, %c0_4], %10 {strides = array<i32>} : memref<16x128xf32, #tpu.memory_space<vmem>>, vector<16x128xf32>,
    return
  }
  func.func @transform_0(%arg0: i32) -> (i32, i32) {
    %c0_i32 = arith.constant 0 : i32
    %c0_i32_0 = arith.constant 0 : i32
    return %arg0, %c0_i32 : i32, i32
  }
  func.func @transform_1(%arg0: i32) -> (i32, i32) {
    %c0_i32 = arith.constant 0 : i32
    %c0_i32_0 = arith.constant 0 : i32
    return %arg0, %c0_i32 : i32, i32
  }
}

</mosaic_0001>

<bundles_post_ra>
// kernel: tpu_custom_call.1
= control target key start
LH: loop header
LB: loop body
LE: loop exit
PB: predicated region body
PF: predicated region fallthrough
CT: control target
= control target key end

     0   :  { %6 = vsyncpa [#allocation3], 0  ;;  %s207_s0 = inlined_call_operand.hbm [shape: f32[16,128], index: 0, kind: input, shape index: {}]   ;;  %s208_s1 = inlined_call_operand.hbm [shape: f32[16,128], index: 1, kind: output, shape index: {}]  }
   0x1   :  { %7 = vsyncpa [#allocation4], 0  ;;  %s12_s8 = sshll.u32 %s207_s0, 4  ;;  %s176_s9 = smov [#allocation2]   ;;  %s13_s8 = int_to_ptr.hbm [resolvable:$true] %s12_s8 }
   0x2   :  { %s14_s10 = sshll.u32 %s176_s9, 4  ;;  %s177_s11 = smov 128   ;;  %s15_s10 = int_to_ptr.vmem [resolvable:$true] %s14_s10 }
   0x3   :  { %s178_s12 = smov 8  }
   0x4   :  { %20 = dma.hbm_to_vmem [thread:$0]  %s13_s8, 256, %s15_s10, [#allocation3], %s177_s11, %s177_s11, %s178_s12  }
   0x5   :  { %172 = dma.done.wait [#allocation3], 256  }
   0x6   :  { %173 = vsyncadd [#allocation3], 4294967040  ;;  %v25_v0 = vld [vmem:[#allocation2] sm:$0xff]  ;;  %v196_v2 = vld [vmem:[#allocation2 + $0x8] sm:$0xff]  ;;  %s179_s0 = smov [#allocation5]   ;;  %s99_s16 = sshll.u32 %s208_s1, 4  ;;  %s100_s16 = int_to_ptr.hbm [resolvable:$true] %s99_s16 }
   0x7   :  { %v27_v1 = vmul.f32 %v25_v0, %v25_v0  ;;  %v28_v3 = vmul.f32 %v196_v2, %v196_v2  ;;  %s97_s13 = sshll.u32 %s179_s0, 4  ;;  %s98_s13 = int_to_ptr.vmem [resolvable:$true] %s97_s13 }
   0x9   :  { %29 = vadd.xlane.f32.xlu0 %v27_v1 }
  0x11   :  { %31 = vadd.xlane.f32.xlu0 %v28_v3 }
  0x7c   :  { %v30_v4 = vpop.xlane.xlu0 %29 }
  0x7d   :  { %116 = vrsqrt.f32 %v30_v4  ;;  %vm40_vm0 = vcmp.eq.f32.partialorder %v30_v4, inf  ;;  %v43_v16 = vand.u32 2147483648, %v30_v4  ;;  %vm42_vm1 = vcmp.eq.f32.partialorder %v30_v4, 0.0 }
  0x83   :  { %v117_v5 = vpop.eup %116 }
  0x84   :  { %v34_v6 = vmul.f32 %v117_v5, %v30_v4  ;;  %v32_v7 = vpop.xlane.xlu0 %31 }
  0x85   :  { %118 = vrsqrt.f32 %v32_v7  ;;  %vm52_vm2 = vcmp.eq.f32.partialorder %v32_v7, inf  ;;  %v55_v24 = vand.u32 2147483648, %v32_v7  ;;  %vm54_vm3 = vcmp.eq.f32.partialorder %v32_v7, 0.0 }
  0x86   :  { %v35_v8 = vmul.f32 %v117_v5, %v34_v6 }
  0x88   :  { %v36_v9 = vmul.f32 0.5, %v35_v8 }
  0x8a   :  { %v37_v10 = vsub.f32 1.5, %v36_v9 }
  0x8b   :  { %v119_v11 = vpop.eup %118 }
  0x8c   :  { %v38_v12 = vmul.f32 %v117_v5, %v37_v10  ;;  %v46_v13 = vmul.f32 %v119_v11, %v32_v7 }
  0x8e   :  { %v39_v14 = vmul.f32 %v38_v12, %v30_v4  ;;  %v47_v15 = vmul.f32 %v119_v11, %v46_v13 }
  0x90   :  { %v41_v17 = vsel %vm40_vm0, %v30_v4, %v39_v14  ;;  %v48_v18 = vmul.f32 0.5, %v47_v15 }
  0x91   :  { %v44_v19 = vsel %vm42_vm1, %v43_v16, %v41_v17 }
  0x92   :  { %v57_v20 = vmax.f32 %v44_v19, 1e-08  ;;  %v49_v21 = vsub.f32 1.5, %v48_v18 }
  0x94   :  { %120 = vrcp.f32 %v57_v20  ;;  %v50_v22 = vmul.f32 %v119_v11, %v49_v21  ;;  %v70_v31 = vand.u32 2147483648, %v57_v20  ;;  %v68_v33 = vand.u32 2147483647, %v57_v20 }
  0x95   :  { %vm64_vm5 = vweird.f32 %v57_v20 }
  0x96   :  { %v51_v23 = vmul.f32 %v50_v22, %v32_v7  ;;  %v71_v36 = vor.u32 1.1754944e-38, %v70_v31  ;;  %vm69_vm7 = vcmp.eq.f32.partialorder %v68_v33, 8.507059e+37 }
  0x98   :  { %v53_v25 = vsel %vm52_vm2, %v32_v7, %v51_v23 }
  0x99   :  { %v56_v26 = vsel %vm54_vm3, %v55_v24, %v53_v25 }
  0x9a   :  { %v121_v27 = vpop.eup %120  ;;  %v58_v28 = vmax.f32 %v56_v26, 1e-08 }
  0x9b   :  { %v60_v29 = vmul.f32 %v121_v27, %v57_v20  ;;  %vm65_vm4 = vweird.f32 %v121_v27 }
  0x9c   :  { %122 = vrcp.f32 %v58_v28  ;;  %vm66_vm6 = vmor %vm64_vm5, %vm65_vm4  ;;  %v85_v42 = vand.u32 2147483648, %v58_v28  ;;  %v83_v44 = vand.u32 2147483647, %v58_v28  ;;  %vm79_vm9 = vweird.f32 %v58_v28 }
  0x9d   :  { %v61_v30 = vsub.f32 1.0, %v60_v29 }
  0x9e   :  { %v86_v46 = vor.u32 1.1754944e-38, %v85_v42  ;;  %vm84_vm11 = vcmp.eq.f32.partialorder %v83_v44, 8.507059e+37 }
  0x9f   :  { %v62_v32 = vmul.f32 %v121_v27, %v61_v30 }
  0xa1   :  { %v63_v34 = vadd.f32 %v121_v27, %v62_v32 }
  0xa2   :  { %v123_v35 = vpop.eup %122 }
  0xa3   :  { %v67_v37 = vsel %vm66_vm6, %v121_v27, %v63_v34  ;;  %v75_v38 = vmul.f32 %v123_v35, %v58_v28  ;;  %vm80_vm8 = vweird.f32 %v123_v35 }
  0xa4   :  { %v72_v39 = vsel %vm69_vm7, %v71_v36, %v67_v37  ;;  %vm81_vm10 = vmor %vm79_vm9, %vm80_vm8 }
  0xa5   :  { %v76_v40 = vsub.f32 1.0, %v75_v38  ;;  %v89_v41 = vmul.f32 %v72_v39, %v25_v0 }
  0xa7   :  { %v77_v43 = vmul.f32 %v123_v35, %v76_v40  ;;  %91 = vst [vmem:[#allocation5] sm:$0xff] %v89_v41 }
  0xa9   :  { %v78_v45 = vadd.f32 %v123_v35, %v77_v43 }
  0xab   :  { %v82_v47 = vsel %vm81_vm10, %v123_v35, %v78_v45 }
  0xac   :  { %v87_v48 = vsel %vm84_vm11, %v86_v46, %v82_v47 }
  0xad   :  { %v90_v49 = vmul.f32 %v87_v48, %v196_v2 }
  0xaf   :  { %92 = vst [vmem:[#allocation5 + $0x8] sm:$0xff] %v90_v49 }
  0xb0   :  { %105 = dma.vmem_to_hbm [thread:$0]  %s98_s13, 256, %s100_s16, [#allocation4], %s177_s11, %s177_s11, %s178_s12  }
  0xb1   :  { %174 = dma.done.wait [#allocation4], 256  }
  0xb2   :  { %175 = vsyncadd [#allocation4], 4294967040 }
  0xb3   :  { %110 = vsyncpa [#allocation3], 1 }
  0xb4   :  { %111 = vsyncpa [#allocation4], 1 }

</bundles_post_ra>
